<compile_context>
chip_gen: v5e
topology: v5e:2x2
jax: 0.10.0
libtpu: 0.0.40
codegen_flags: <defaults>
</compile_context>

<pallas_src>
import math
import functools

import jax
import jax.numpy as jnp
from jax.experimental import pallas as pl
from jax.experimental.pallas import tpu as pltpu

# ---------------------------------------------------------------------------
# Model hyper-parameters (small, consistent with the module's __init__ args)
# ---------------------------------------------------------------------------
SEQ_LEN = 8          # L
BATCH = 2            # N
INPUT_DIM = 32       # E  (embed dim)
NUM_HEADS = 4
HEAD_DIM = INPUT_DIM // NUM_HEADS
HIDDEN_DIM = 64      # FFN hidden
LN_EPS = 1e-5


def _layer_norm(x, gamma, beta):
    # LayerNorm over the last dim, biased variance, eps=1e-5 (PyTorch default).
    mean = jnp.mean(x, axis=-1, keepdims=True)
    var = jnp.mean((x - mean) ** 2, axis=-1, keepdims=True)
    return (x - mean) * jax.lax.rsqrt(var + LN_EPS) * gamma + beta


def _encoder_kernel(x_ref,      # (L*N, E) f32   all rows of all batches (row = l*N + n)
                    wqkv_ref,   # (E, 3E) bf16   in-proj weight, Q cols pre-scaled by 1/sqrt(Dh)
                    wo_ref,     # (E, E)  bf16   out-proj weight (pre-transposed, unsplit)
                    w1_ref,     # (E, HID) bf16  ffn linear1 (pre-transposed)
                    w2_ref,     # (HID, E) bf16  ffn linear2 (pre-transposed)
                    vec_ref,    # (8, max(3E,HID)) f32  packed biases / LN gains & shifts
                    o_ref,      # (L*N, E)
                    ctx_ref,    # (L*N, E) f32   VMEM scratch: concatenated head contexts
                    *, num_heads, head_dim, batch):
    rows, e = x_ref.shape
    hid = w1_ref.shape[1]

    x = x_ref[...]                                   # f32 (rows, E)
    xb = x.astype(jnp.bfloat16)

    # Packed 1-D params (one sublane row each).
    b_qkv = vec_ref[0:1, 0:3 * e]                    # (1, 3E) -- Q slice pre-scaled
    b_out = vec_ref[1:2, 0:e]
    ln1_g = vec_ref[2:3, 0:e]
    ln1_b = vec_ref[3:4, 0:e]
    b_ff1 = vec_ref[4:5, 0:hid]
    b_ff2 = vec_ref[5:6, 0:e]
    ln2_g = vec_ref[6:7, 0:e]
    ln2_b = vec_ref[7:8, 0:e]

    # ---- QKV projection for every (seq, batch) row at once ------------------
    qkv = jnp.dot(xb, wqkv_ref[...], preferred_element_type=jnp.float32) + b_qkv
    qkvb = qkv.astype(jnp.bfloat16)                  # cast once; per-head views are slices

    # ---- block-diagonal batch mask, built in-kernel --------------------------
    # Rows are interleaved (row = l*N + n): same batch iff row % N == col % N.
    row_ids = jax.lax.broadcasted_iota(jnp.int32, (rows, rows), 0)
    col_ids = jax.lax.broadcasted_iota(jnp.int32, (rows, rows), 1)
    attn_bias = jnp.where((row_ids % batch) == (col_ids % batch), 0.0, -1e30)

    qkt_dims = (((1,), (1,)), ((), ()))              # q @ k^T without materializing k.T

    # ---- per-head attention (static, fully unrolled; H=4) -------------------
    for h in range(num_heads):
        lo, hi = h * head_dim, (h + 1) * head_dim
        qh = qkvb[:, lo:hi]                          # scale already folded into weights
        kh = qkvb[:, e + lo:e + hi]
        vh = qkvb[:, 2 * e + lo:2 * e + hi]

        s = jax.lax.dot_general(qh, kh, qkt_dims,
                                preferred_element_type=jnp.float32)        # (rows, rows)
        s = s + attn_bias
        s = s - jnp.max(s, axis=-1, keepdims=True)   # softmax max-shift in f32
        p = jnp.exp(s)
        # Deferred normalization: P@V first, scale by 1/rowsum after (commutes).
        head = jnp.dot(p.astype(jnp.bfloat16), vh,
                       preferred_element_type=jnp.float32)                 # (rows, Dh)
        head = head * pl.reciprocal(jnp.sum(p, axis=-1, keepdims=True), approx=True)
        ctx_ref[:, lo:hi] = head                     # static-lane-offset "concat"

    # ---- single output projection over all heads ------------------------------
    attn = jnp.dot(ctx_ref[...].astype(jnp.bfloat16), wo_ref[...],
                   preferred_element_type=jnp.float32) + b_out

    # ---- residual + LayerNorm 1 (f32) ---------------------------------------
    x1 = _layer_norm(x + attn, ln1_g, ln1_b)

    # ---- feed-forward --------------------------------------------------------
    h1 = jnp.dot(x1.astype(jnp.bfloat16), w1_ref[...],
                 preferred_element_type=jnp.float32) + b_ff1
    h1 = jnp.maximum(h1, 0.0)                                              # ReLU
    ff = jnp.dot(h1.astype(jnp.bfloat16), w2_ref[...],
                 preferred_element_type=jnp.float32) + b_ff2

    # ---- residual + LayerNorm 2 (f32) ---------------------------------------
    o_ref[...] = _layer_norm(x1 + ff, ln2_g, ln2_b).astype(o_ref.dtype)


def prepare_params(params):
    """One-time weight formatting. Call at parameter-load time, NOT per forward."""
    E = INPUT_DIM
    HID = params["w1"].shape[0]
    scale = 1.0 / math.sqrt(HEAD_DIM)

    # Fold 1/sqrt(Dh) into the Q output-rows of the in-projection (and its bias).
    q_scale = jnp.concatenate([jnp.full((E,), scale, jnp.float32),
                               jnp.ones((2 * E,), jnp.float32)])
    wqkv = (params["in_proj_w"] * q_scale[:, None]).T.astype(jnp.bfloat16)  # (E, 3E)
    b_qkv = params["in_proj_b"] * q_scale                                   # (3E,)

    wo = params["out_proj_w"].T.astype(jnp.bfloat16)                        # (E, E)
    w1 = params["w1"].T.astype(jnp.bfloat16)                                # (E, HID)
    w2 = params["w2"].T.astype(jnp.bfloat16)                                # (HID, E)

    # Pack the eight 1-D parameters into a single (8, max(3E, HID)) f32 tile.
    width = max(3 * E, HID)
    row = lambda v: jnp.pad(v, (0, width - v.shape[0]))[None, :]
    vecs = jnp.concatenate([
        row(b_qkv), row(params["out_proj_b"]),
        row(params["ln1_g"]), row(params["ln1_b"]),
        row(params["b1"]), row(params["b2"]),
        row(params["ln2_g"]), row(params["ln2_b"]),
    ], axis=0).astype(jnp.float32)

    return {"wqkv": wqkv, "wo": wo, "w1": w1, "w2": w2, "vecs": vecs}


@jax.jit
def transformer_encoder_layer(x_lne, prepped):
    """x_lne: (L, N, E) float32 (PyTorch seq-first). prepped: prepare_params() output."""
    L, N, E = x_lne.shape

    # Free row-major flatten (row = l*N + n): no transposes, no activation copies.
    x2d = x_lne.reshape(L * N, E)

    kernel = functools.partial(_encoder_kernel,
                               num_heads=NUM_HEADS, head_dim=HEAD_DIM, batch=N)

    vmem = pl.BlockSpec(memory_space=pltpu.MemorySpace.VMEM)
    out2d = pl.pallas_call(
        kernel,
        out_shape=jax.ShapeDtypeStruct((L * N, E), x_lne.dtype),
        in_specs=[vmem] * 6,
        out_specs=vmem,
        scratch_shapes=[pltpu.VMEM((L * N, E), jnp.float32)],
    )(x2d, prepped["wqkv"], prepped["wo"], prepped["w1"], prepped["w2"],
      prepped["vecs"])

    return out2d.reshape(L, N, E)                    # free reshape back to (L, N, E)


# ---------------------------------------------------------------------------
# Pure-JAX reference. matmul_dtype=f32 reproduces the PyTorch module exactly;
# matmul_dtype=bf16 mirrors the kernel's bf16 matmul inputs (f32 accumulation).
# ---------------------------------------------------------------------------
def reference(x_lne, params, matmul_dtype=jnp.float32):
    L, N, E = x_lne.shape
    HID = params["w1"].shape[0]
    md = matmul_dtype

    def mm(a, b):
        return jnp.dot(a.astype(md), b.astype(md),
                       preferred_element_type=jnp.float32)

    x = jnp.transpose(x_lne, (1, 0, 2))                                   # (N, L, E)
    qkv = mm(x.reshape(N * L, E), params["in_proj_w"].T).reshape(N, L, 3 * E)
    qkv = qkv + params["in_proj_b"]
    q, k, v = jnp.split(qkv, 3, axis=-1)

    def heads(t):  # (N, L, E) -> (N, H, L, Dh)
        return jnp.transpose(t.reshape(N, L, NUM_HEADS, HEAD_DIM), (0, 2, 1, 3))

    qh, kh, vh = heads(q), heads(k), heads(v)
    qh = qh / math.sqrt(HEAD_DIM)
    s = jnp.einsum("nhqd,nhkd->nhqk", qh.astype(md), kh.astype(md),
                   preferred_element_type=jnp.float32)
    p = jax.nn.softmax(s, axis=-1)
    o = jnp.einsum("nhqk,nhkd->nhqd", p.astype(md), vh.astype(md),
                   preferred_element_type=jnp.float32)
    o = jnp.transpose(o, (0, 2, 1, 3)).reshape(N * L, E)
    attn = mm(o, params["out_proj_w"].T).reshape(N, L, E) + params["out_proj_b"]

    def ln(t, g, b):
        m = jnp.mean(t, axis=-1, keepdims=True)
        var = jnp.mean((t - m) ** 2, axis=-1, keepdims=True)
        return (t - m) / jnp.sqrt(var + LN_EPS) * g + b

    x1 = ln(x + attn, params["ln1_g"], params["ln1_b"])
    h1 = jnp.maximum(mm(x1.reshape(N * L, E), params["w1"].T).reshape(N, L, HID)
                     + params["b1"], 0.0)
    ff = mm(h1.reshape(N * L, HID), params["w2"].T).reshape(N, L, E) + params["b2"]
    x2 = ln(x1 + ff, params["ln2_g"], params["ln2_b"])
    return jnp.transpose(x2, (1, 0, 2))                                   # (L, N, E)


def init_params(key):
    ks = jax.random.split(key, 8)
    scale = 0.1
    return {
        "in_proj_w":  scale * jax.random.normal(ks[0], (3 * INPUT_DIM, INPUT_DIM), jnp.float32),
        "in_proj_b":  scale * jax.random.normal(ks[1], (3 * INPUT_DIM,), jnp.float32),
        "out_proj_w": scale * jax.random.normal(ks[2], (INPUT_DIM, INPUT_DIM), jnp.float32),
        "out_proj_b": scale * jax.random.normal(ks[3], (INPUT_DIM,), jnp.float32),
        "ln1_g": jnp.ones((INPUT_DIM,), jnp.float32),
        "ln1_b": jnp.zeros((INPUT_DIM,), jnp.float32),
        "w1": scale * jax.random.normal(ks[4], (HIDDEN_DIM, INPUT_DIM), jnp.float32),
        "b1": scale * jax.random.normal(ks[5], (HIDDEN_DIM,), jnp.float32),
        "w2": scale * jax.random.normal(ks[6], (INPUT_DIM, HIDDEN_DIM), jnp.float32),
        "b2": scale * jax.random.normal(ks[7], (INPUT_DIM,), jnp.float32),
        "ln2_g": jnp.ones((INPUT_DIM,), jnp.float32),
        "ln2_b": jnp.zeros((INPUT_DIM,), jnp.float32),
    }


if __name__ == "__main__":
    key = jax.random.PRNGKey(0)
    k_x, k_p = jax.random.split(key)
    x = jax.random.normal(k_x, (SEQ_LEN, BATCH, INPUT_DIM), jnp.float32)  # (L, N, E)
    params = init_params(k_p)

    # One-time weight formatting (outside the jitted forward path).
    prepped = jax.tree_util.tree_map(jax.block_until_ready, prepare_params(params))

    out = jax.block_until_ready(transformer_encoder_layer(x, prepped))
    assert out.shape == (SEQ_LEN, BATCH, INPUT_DIM)

    # (1) Logic check: reference using the same bf16-matmul numerics as the kernel.
    ref_bf16 = jax.block_until_ready(reference(x, params, jnp.bfloat16))
    assert jnp.allclose(out, ref_bf16, rtol=2e-2, atol=2e-2), \
        f"bf16-ref max abs err {jnp.max(jnp.abs(out - ref_bf16))}"

    # (2) Fidelity check vs. the full-f32 PyTorch-equivalent reference.  The
    # tolerance is looser only because matmul inputs are bf16 (per perf review).
    ref_f32 = jax.block_until_ready(reference(x, params, jnp.float32))
    assert jnp.allclose(out, ref_f32, rtol=5e-2, atol=5e-2), \
        f"f32-ref max abs err {jnp.max(jnp.abs(out - ref_f32))}"

    print("KERNEL_OK")
</pallas_src>

<mosaic_0001>
module attributes {stable_mosaic.version = 11 : i64} {
  func.func @_encoder_kernel(%arg0: memref<16x32xf32, #tpu.memory_space<vmem>>, %arg1: memref<32x96xbf16, #tpu.memory_space<vmem>>, %arg2: memref<32x32xbf16, #tpu.memory_space<vmem>>, %arg3: memref<32x64xbf16, #tpu.memory_space<vmem>>, %arg4: memref<64x32xbf16, #tpu.memory_space<vmem>>, %arg5: memref<8x96xf32, #tpu.memory_space<vmem>>, %arg6: memref<16x32xf32, #tpu.memory_space<vmem>>, %arg7: memref<16x32xf32, #tpu.memory_space<vmem>>) attributes {dimension_semantics = [], scalar_prefetch = 0 : i64, scratch_operands = 1 : i64, tpu.core_type = #tpu.core_type<tc>} {
    %c0 = arith.constant 0 : index
    %c0_0 = arith.constant 0 : index
    %0 = vector.load %arg0[%c0, %c0_0] : memref<16x32xf32, #tpu.memory_space<vmem>>, vector<16x32xf32>
    %1 = arith.truncf %0 : vector<16x32xf32> to vector<16x32xbf16>
    %c0_1 = arith.constant 0 : index
    %c0_2 = arith.constant 0 : index
    %2 = vector.load %arg5[%c0_1, %c0_2] : memref<8x96xf32, #tpu.memory_space<vmem>>, vector<1x96xf32>
    %c1 = arith.constant 1 : index
    %c0_3 = arith.constant 0 : index
    %3 = vector.load %arg5[%c1, %c0_3] : memref<8x96xf32, #tpu.memory_space<vmem>>, vector<1x32xf32>
    %c2 = arith.constant 2 : index
    %c0_4 = arith.constant 0 : index
    %4 = vector.load %arg5[%c2, %c0_4] : memref<8x96xf32, #tpu.memory_space<vmem>>, vector<1x32xf32>
    %c3 = arith.constant 3 : index
    %c0_5 = arith.constant 0 : index
    %5 = vector.load %arg5[%c3, %c0_5] : memref<8x96xf32, #tpu.memory_space<vmem>>, vector<1x32xf32>
    %c4 = arith.constant 4 : index
    %c0_6 = arith.constant 0 : index
    %6 = vector.load %arg5[%c4, %c0_6] : memref<8x96xf32, #tpu.memory_space<vmem>>, vector<1x64xf32>
    %c5 = arith.constant 5 : index
    %c0_7 = arith.constant 0 : index
    %7 = vector.load %arg5[%c5, %c0_7] : memref<8x96xf32, #tpu.memory_space<vmem>>, vector<1x32xf32>
    %c6 = arith.constant 6 : index
    %c0_8 = arith.constant 0 : index
    %8 = vector.load %arg5[%c6, %c0_8] : memref<8x96xf32, #tpu.memory_space<vmem>>, vector<1x32xf32>
    %c7 = arith.constant 7 : index
    %c0_9 = arith.constant 0 : index
    %9 = vector.load %arg5[%c7, %c0_9] : memref<8x96xf32, #tpu.memory_space<vmem>>, vector<1x32xf32>
    %c0_10 = arith.constant 0 : index
    %c0_11 = arith.constant 0 : index
    %10 = vector.load %arg1[%c0_10, %c0_11] : memref<32x96xbf16, #tpu.memory_space<vmem>>, vector<32x96xbf16>
    %cst = arith.constant dense<0.000000e+00> : vector<16x96xf32>
    %11 = tpu.matmul %1, %10, %cst {dimension_numbers = #tpu.dot_dimension_numbers<[1], [0], [0], [1], [0, 0, 1, 1], [], []>} : vector<16x32xbf16>, vector<32x96xbf16>, vector<16x96xf32> -> vector<16x96xf32>
    %12 = vector.broadcast %2 : vector<1x96xf32> to vector<16x96xf32>
    %13 = arith.addf %11, %12 : vector<16x96xf32>
    %14 = arith.truncf %13 : vector<16x96xf32> to vector<16x96xbf16>
    %15 = tpu.iota {dimensions = array<i32: 0>} : vector<16x16xi32>
    %16 = tpu.iota {dimensions = array<i32: 1>} : vector<16x16xi32>
    %c2_i32 = arith.constant 2 : i32
    %c0_i32 = arith.constant 0 : i32
    %17 = arith.cmpi eq, %c2_i32, %c0_i32 : i32
    %c1_i32 = arith.constant 1 : i32
    %18 = arith.select %17, %c1_i32, %c2_i32 : i32
    %19 = vector.broadcast %18 : i32 to vector<16x16xi32>
    %20 = arith.remsi %15, %19 : vector<16x16xi32>
    %c0_i32_12 = arith.constant 0 : i32
    %21 = vector.broadcast %c0_i32_12 : i32 to vector<16x16xi32>
    %22 = arith.cmpi ne, %20, %21 : vector<16x16xi32>
    %c0_i32_13 = arith.constant 0 : i32
    %23 = vector.broadcast %c0_i32_13 : i32 to vector<16x16xi32>
    %24 = arith.cmpi slt, %20, %23 : vector<16x16xi32>
    %c0_i32_14 = arith.constant 0 : i32
    %25 = arith.cmpi slt, %18, %c0_i32_14 : i32
    %26 = vector.broadcast %25 : i1 to vector<16x16xi1>
    %27 = vector.broadcast %26 : vector<16x16xi1> to vector<16x16xi1>
    %28 = arith.xori %24, %27 : vector<16x16xi1>
    %29 = arith.andi %28, %22 : vector<16x16xi1>
    %30 = vector.broadcast %18 : i32 to vector<16x16xi32>
    %31 = arith.addi %20, %30 : vector<16x16xi32>
    %32 = arith.select %29, %31, %20 : vector<16x16xi1>, vector<16x16xi32>
    %c2_i32_15 = arith.constant 2 : i32
    %c0_i32_16 = arith.constant 0 : i32
    %33 = arith.cmpi eq, %c2_i32_15, %c0_i32_16 : i32
    %c1_i32_17 = arith.constant 1 : i32
    %34 = arith.select %33, %c1_i32_17, %c2_i32_15 : i32
    %35 = vector.broadcast %34 : i32 to vector<16x16xi32>
    %36 = arith.remsi %16, %35 : vector<16x16xi32>
    %c0_i32_18 = arith.constant 0 : i32
    %37 = vector.broadcast %c0_i32_18 : i32 to vector<16x16xi32>
    %38 = arith.cmpi ne, %36, %37 : vector<16x16xi32>
    %c0_i32_19 = arith.constant 0 : i32
    %39 = vector.broadcast %c0_i32_19 : i32 to vector<16x16xi32>
    %40 = arith.cmpi slt, %36, %39 : vector<16x16xi32>
    %c0_i32_20 = arith.constant 0 : i32
    %41 = arith.cmpi slt, %34, %c0_i32_20 : i32
    %42 = vector.broadcast %41 : i1 to vector<16x16xi1>
    %43 = vector.broadcast %42 : vector<16x16xi1> to vector<16x16xi1>
    %44 = arith.xori %40, %43 : vector<16x16xi1>
    %45 = arith.andi %44, %38 : vector<16x16xi1>
    %46 = vector.broadcast %34 : i32 to vector<16x16xi32>
    %47 = arith.addi %36, %46 : vector<16x16xi32>
    %48 = arith.select %45, %47, %36 : vector<16x16xi1>, vector<16x16xi32>
    %49 = arith.cmpi eq, %32, %48 : vector<16x16xi32>
    %cst_21 = arith.constant 0.000000e+00 : f32
    %cst_22 = arith.constant -1.000000e+30 : f32
    %50 = vector.broadcast %cst_21 : f32 to vector<16x16xf32>
    %51 = vector.broadcast %cst_22 : f32 to vector<16x16xf32>
    %52 = arith.select %49, %50, %51 : vector<16x16xi1>, vector<16x16xf32>
    %53 = vector.extract_strided_slice %14 {offsets = [0, 0], sizes = [16, 8], strides = [1, 1]} : vector<16x96xbf16> to vector<16x8xbf16>
    %54 = vector.extract_strided_slice %14 {offsets = [0, 32], sizes = [16, 8], strides = [1, 1]} : vector<16x96xbf16> to vector<16x8xbf16>
    %55 = vector.extract_strided_slice %14 {offsets = [0, 64], sizes = [16, 8], strides = [1, 1]} : vector<16x96xbf16> to vector<16x8xbf16>
    %cst_23 = arith.constant dense<0.000000e+00> : vector<16x16xf32>
    %56 = tpu.matmul %53, %54, %cst_23 {dimension_numbers = #tpu.dot_dimension_numbers<[1], [1], [0], [0], [0, 0, 1, 0], [], []>} : vector<16x8xbf16>, vector<16x8xbf16>, vector<16x16xf32> -> vector<16x16xf32>
    %57 = arith.addf %56, %52 : vector<16x16xf32>
    %cst_24 = arith.constant dense<0xFF800000> : vector<16xf32>
    %58 = vector.multi_reduction <maximumf>, %57, %cst_24 [1] : vector<16x16xf32> to vector<16xf32>
    %59 = vector.shape_cast %58 : vector<16xf32> to vector<16x1xf32>
    %60 = vector.broadcast %59 : vector<16x1xf32> to vector<16x16xf32>
    %61 = arith.subf %57, %60 : vector<16x16xf32>
    %62 = math.exp %61 : vector<16x16xf32>
    %63 = arith.truncf %62 : vector<16x16xf32> to vector<16x16xbf16>
    %cst_25 = arith.constant dense<0.000000e+00> : vector<16x8xf32>
    %64 = tpu.matmul %63, %55, %cst_25 {dimension_numbers = #tpu.dot_dimension_numbers<[1], [0], [0], [1], [0, 0, 1, 1], [], []>} : vector<16x16xbf16>, vector<16x8xbf16>, vector<16x8xf32> -> vector<16x8xf32>
    %cst_26 = arith.constant dense<0.000000e+00> : vector<16xf32>
    %65 = vector.multi_reduction <add>, %62, %cst_26 [1] : vector<16x16xf32> to vector<16xf32>
    %66 = vector.shape_cast %65 : vector<16xf32> to vector<16x1xf32>
    %67 = tpu.reciprocal %66 {approx = true} : vector<16x1xf32> -> vector<16x1xf32>
    %68 = vector.broadcast %67 : vector<16x1xf32> to vector<16x8xf32>
    %69 = arith.mulf %64, %68 : vector<16x8xf32>
    %c0_27 = arith.constant 0 : index
    %c0_28 = arith.constant 0 : index
    %70 = vector.load %arg7[%c0_27, %c0_28] : memref<16x32xf32, #tpu.memory_space<vmem>>, vector<16x8xf32>
    tpu.vector_store %arg7[%c0_27, %c0_28], %69 {strides = array<i32>} : memref<16x32xf32, #tpu.memory_space<vmem>>, vector<16x8xf32>,
    %71 = vector.extract_strided_slice %14 {offsets = [0, 8], sizes = [16, 8], strides = [1, 1]} : vector<16x96xbf16> to vector<16x8xbf16>
    %72 = vector.extract_strided_slice %14 {offsets = [0, 40], sizes = [16, 8], strides = [1, 1]} : vector<16x96xbf16> to vector<16x8xbf16>
    %73 = vector.extract_strided_slice %14 {offsets = [0, 72], sizes = [16, 8], strides = [1, 1]} : vector<16x96xbf16> to vector<16x8xbf16>
    %cst_29 = arith.constant dense<0.000000e+00> : vector<16x16xf32>
    %74 = tpu.matmul %71, %72, %cst_29 {dimension_numbers = #tpu.dot_dimension_numbers<[1], [1], [0], [0], [0, 0, 1, 0], [], []>} : vector<16x8xbf16>, vector<16x8xbf16>, vector<16x16xf32> -> vector<16x16xf32>
    %75 = arith.addf %74, %52 : vector<16x16xf32>
    %cst_30 = arith.constant dense<0xFF800000> : vector<16xf32>
    %76 = vector.multi_reduction <maximumf>, %75, %cst_30 [1] : vector<16x16xf32> to vector<16xf32>
    %77 = vector.shape_cast %76 : vector<16xf32> to vector<16x1xf32>
    %78 = vector.broadcast %77 : vector<16x1xf32> to vector<16x16xf32>
    %79 = arith.subf %75, %78 : vector<16x16xf32>
    %80 = math.exp %79 : vector<16x16xf32>
    %81 = arith.truncf %80 : vector<16x16xf32> to vector<16x16xbf16>
    %cst_31 = arith.constant dense<0.000000e+00> : vector<16x8xf32>
    %82 = tpu.matmul %81, %73, %cst_31 {dimension_numbers = #tpu.dot_dimension_numbers<[1], [0], [0], [1], [0, 0, 1, 1], [], []>} : vector<16x16xbf16>, vector<16x8xbf16>, vector<16x8xf32> -> vector<16x8xf32>
    %cst_32 = arith.constant dense<0.000000e+00> : vector<16xf32>
    %83 = vector.multi_reduction <add>, %80, %cst_32 [1] : vector<16x16xf32> to vector<16xf32>
    %84 = vector.shape_cast %83 : vector<16xf32> to vector<16x1xf32>
    %85 = tpu.reciprocal %84 {approx = true} : vector<16x1xf32> -> vector<16x1xf32>
    %86 = vector.broadcast %85 : vector<16x1xf32> to vector<16x8xf32>
    %87 = arith.mulf %82, %86 : vector<16x8xf32>
    %c0_33 = arith.constant 0 : index
    %c8 = arith.constant 8 : index
    %88 = vector.load %arg7[%c0_33, %c8] : memref<16x32xf32, #tpu.memory_space<vmem>>, vector<16x8xf32>
    tpu.vector_store %arg7[%c0_33, %c8], %87 {strides = array<i32>} : memref<16x32xf32, #tpu.memory_space<vmem>>, vector<16x8xf32>,
    %89 = vector.extract_strided_slice %14 {offsets = [0, 16], sizes = [16, 8], strides = [1, 1]} : vector<16x96xbf16> to vector<16x8xbf16>
    %90 = vector.extract_strided_slice %14 {offsets = [0, 48], sizes = [16, 8], strides = [1, 1]} : vector<16x96xbf16> to vector<16x8xbf16>
    %91 = vector.extract_strided_slice %14 {offsets = [0, 80], sizes = [16, 8], strides = [1, 1]} : vector<16x96xbf16> to vector<16x8xbf16>
    %cst_34 = arith.constant dense<0.000000e+00> : vector<16x16xf32>
    %92 = tpu.matmul %89, %90, %cst_34 {dimension_numbers = #tpu.dot_dimension_numbers<[1], [1], [0], [0], [0, 0, 1, 0], [], []>} : vector<16x8xbf16>, vector<16x8xbf16>, vector<16x16xf32> -> vector<16x16xf32>
    %93 = arith.addf %92, %52 : vector<16x16xf32>
    %cst_35 = arith.constant dense<0xFF800000> : vector<16xf32>
    %94 = vector.multi_reduction <maximumf>, %93, %cst_35 [1] : vector<16x16xf32> to vector<16xf32>
    %95 = vector.shape_cast %94 : vector<16xf32> to vector<16x1xf32>
    %96 = vector.broadcast %95 : vector<16x1xf32> to vector<16x16xf32>
    %97 = arith.subf %93, %96 : vector<16x16xf32>
    %98 = math.exp %97 : vector<16x16xf32>
    %99 = arith.truncf %98 : vector<16x16xf32> to vector<16x16xbf16>
    %cst_36 = arith.constant dense<0.000000e+00> : vector<16x8xf32>
    %100 = tpu.matmul %99, %91, %cst_36 {dimension_numbers = #tpu.dot_dimension_numbers<[1], [0], [0], [1], [0, 0, 1, 1], [], []>} : vector<16x16xbf16>, vector<16x8xbf16>, vector<16x8xf32> -> vector<16x8xf32>
    %cst_37 = arith.constant dense<0.000000e+00> : vector<16xf32>
    %101 = vector.multi_reduction <add>, %98, %cst_37 [1] : vector<16x16xf32> to vector<16xf32>
    %102 = vector.shape_cast %101 : vector<16xf32> to vector<16x1xf32>
    %103 = tpu.reciprocal %102 {approx = true} : vector<16x1xf32> -> vector<16x1xf32>
    %104 = vector.broadcast %103 : vector<16x1xf32> to vector<16x8xf32>
    %105 = arith.mulf %100, %104 : vector<16x8xf32>
    %c0_38 = arith.constant 0 : index
    %c16 = arith.constant 16 : index
    %106 = vector.load %arg7[%c0_38, %c16] : memref<16x32xf32, #tpu.memory_space<vmem>>, vector<16x8xf32>
    tpu.vector_store %arg7[%c0_38, %c16], %105 {strides = array<i32>} : memref<16x32xf32, #tpu.memory_space<vmem>>, vector<16x8xf32>,
    %107 = vector.extract_strided_slice %14 {offsets = [0, 24], sizes = [16, 8], strides = [1, 1]} : vector<16x96xbf16> to vector<16x8xbf16>
    %108 = vector.extract_strided_slice %14 {offsets = [0, 56], sizes = [16, 8], strides = [1, 1]} : vector<16x96xbf16> to vector<16x8xbf16>
    %109 = vector.extract_strided_slice %14 {offsets = [0, 88], sizes = [16, 8], strides = [1, 1]} : vector<16x96xbf16> to vector<16x8xbf16>
    %cst_39 = arith.constant dense<0.000000e+00> : vector<16x16xf32>
    %110 = tpu.matmul %107, %108, %cst_39 {dimension_numbers = #tpu.dot_dimension_numbers<[1], [1], [0], [0], [0, 0, 1, 0], [], []>} : vector<16x8xbf16>, vector<16x8xbf16>, vector<16x16xf32> -> vector<16x16xf32>
    %111 = arith.addf %110, %52 : vector<16x16xf32>
    %cst_40 = arith.constant dense<0xFF800000> : vector<16xf32>
    %112 = vector.multi_reduction <maximumf>, %111, %cst_40 [1] : vector<16x16xf32> to vector<16xf32>
    %113 = vector.shape_cast %112 : vector<16xf32> to vector<16x1xf32>
    %114 = vector.broadcast %113 : vector<16x1xf32> to vector<16x16xf32>
    %115 = arith.subf %111, %114 : vector<16x16xf32>
    %116 = math.exp %115 : vector<16x16xf32>
    %117 = arith.truncf %116 : vector<16x16xf32> to vector<16x16xbf16>
    %cst_41 = arith.constant dense<0.000000e+00> : vector<16x8xf32>
    %118 = tpu.matmul %117, %109, %cst_41 {dimension_numbers = #tpu.dot_dimension_numbers<[1], [0], [0], [1], [0, 0, 1, 1], [], []>} : vector<16x16xbf16>, vector<16x8xbf16>, vector<16x8xf32> -> vector<16x8xf32>
    %cst_42 = arith.constant dense<0.000000e+00> : vector<16xf32>
    %119 = vector.multi_reduction <add>, %116, %cst_42 [1] : vector<16x16xf32> to vector<16xf32>
    %120 = vector.shape_cast %119 : vector<16xf32> to vector<16x1xf32>
    %121 = tpu.reciprocal %120 {approx = true} : vector<16x1xf32> -> vector<16x1xf32>
    %122 = vector.broadcast %121 : vector<16x1xf32> to vector<16x8xf32>
    %123 = arith.mulf %118, %122 : vector<16x8xf32>
    %c0_43 = arith.constant 0 : index
    %c24 = arith.constant 24 : index
    %124 = vector.load %arg7[%c0_43, %c24] : memref<16x32xf32, #tpu.memory_space<vmem>>, vector<16x8xf32>
    tpu.vector_store %arg7[%c0_43, %c24], %123 {strides = array<i32>} : memref<16x32xf32, #tpu.memory_space<vmem>>, vector<16x8xf32>,
    %c0_44 = arith.constant 0 : index
    %c0_45 = arith.constant 0 : index
    %125 = vector.load %arg7[%c0_44, %c0_45] : memref<16x32xf32, #tpu.memory_space<vmem>>, vector<16x32xf32>
    %126 = arith.truncf %125 : vector<16x32xf32> to vector<16x32xbf16>
    %c0_46 = arith.constant 0 : index
    %c0_47 = arith.constant 0 : index
    %127 = vector.load %arg2[%c0_46, %c0_47] : memref<32x32xbf16, #tpu.memory_space<vmem>>, vector<32x32xbf16>
    %cst_48 = arith.constant dense<0.000000e+00> : vector<16x32xf32>
    %128 = tpu.matmul %126, %127, %cst_48 {dimension_numbers = #tpu.dot_dimension_numbers<[1], [0], [0], [1], [0, 0, 1, 1], [], []>} : vector<16x32xbf16>, vector<32x32xbf16>, vector<16x32xf32> -> vector<16x32xf32>
    %129 = vector.broadcast %3 : vector<1x32xf32> to vector<16x32xf32>
    %130 = arith.addf %128, %129 : vector<16x32xf32>
    %131 = arith.addf %0, %130 : vector<16x32xf32>
    %cst_49 = arith.constant dense<0.000000e+00> : vector<16xf32>
    %132 = vector.multi_reduction <add>, %131, %cst_49 [1] : vector<16x32xf32> to vector<16xf32>
    %133 = vector.shape_cast %132 : vector<16xf32> to vector<16x1xf32>
    %cst_50 = arith.constant 3.200000e+01 : f32
    %134 = vector.broadcast %cst_50 : f32 to vector<16x1xf32>
    %135 = arith.divf %133, %134 : vector<16x1xf32>
    %136 = vector.broadcast %135 : vector<16x1xf32> to vector<16x32xf32>
    %137 = arith.subf %131, %136 : vector<16x32xf32>
    %138 = arith.mulf %137, %137 : vector<16x32xf32>
    %cst_51 = arith.constant dense<0.000000e+00> : vector<16xf32>
    %139 = vector.multi_reduction <add>, %138, %cst_51 [1] : vector<16x32xf32> to vector<16xf32>
    %140 = vector.shape_cast %139 : vector<16xf32> to vector<16x1xf32>
    %cst_52 = arith.constant 3.200000e+01 : f32
    %141 = vector.broadcast %cst_52 : f32 to vector<16x1xf32>
    %142 = arith.divf %140, %141 : vector<16x1xf32>
    %143 = vector.broadcast %135 : vector<16x1xf32> to vector<16x32xf32>
    %144 = arith.subf %131, %143 : vector<16x32xf32>
    %cst_53 = arith.constant 9.99999974E-6 : f32
    %145 = vector.broadcast %cst_53 : f32 to vector<16x1xf32>
    %146 = arith.addf %142, %145 : vector<16x1xf32>
    %147 = math.rsqrt %146 : vector<16x1xf32>
    %148 = vector.broadcast %147 : vector<16x1xf32> to vector<16x32xf32>
    %149 = arith.mulf %144, %148 : vector<16x32xf32>
    %150 = vector.broadcast %4 : vector<1x32xf32> to vector<16x32xf32>
    %151 = arith.mulf %149, %150 : vector<16x32xf32>
    %152 = vector.broadcast %5 : vector<1x32xf32> to vector<16x32xf32>
    %153 = arith.addf %151, %152 : vector<16x32xf32>
    %154 = arith.truncf %153 : vector<16x32xf32> to vector<16x32xbf16>
    %c0_54 = arith.constant 0 : index
    %c0_55 = arith.constant 0 : index
    %155 = vector.load %arg3[%c0_54, %c0_55] : memref<32x64xbf16, #tpu.memory_space<vmem>>, vector<32x64xbf16>
    %cst_56 = arith.constant dense<0.000000e+00> : vector<16x64xf32>
    %156 = tpu.matmul %154, %155, %cst_56 {dimension_numbers = #tpu.dot_dimension_numbers<[1], [0], [0], [1], [0, 0, 1, 1], [], []>} : vector<16x32xbf16>, vector<32x64xbf16>, vector<16x64xf32> -> vector<16x64xf32>
    %157 = vector.broadcast %6 : vector<1x64xf32> to vector<16x64xf32>
    %158 = arith.addf %156, %157 : vector<16x64xf32>
    %cst_57 = arith.constant 0.000000e+00 : f32
    %159 = vector.broadcast %cst_57 : f32 to vector<16x64xf32>
    %160 = arith.maximumf %158, %159 : vector<16x64xf32>
    %161 = arith.truncf %160 : vector<16x64xf32> to vector<16x64xbf16>
    %c0_58 = arith.constant 0 : index
    %c0_59 = arith.constant 0 : index
    %162 = vector.load %arg4[%c0_58, %c0_59] : memref<64x32xbf16, #tpu.memory_space<vmem>>, vector<64x32xbf16>
    %cst_60 = arith.constant dense<0.000000e+00> : vector<16x32xf32>
    %163 = tpu.matmul %161, %162, %cst_60 {dimension_numbers = #tpu.dot_dimension_numbers<[1], [0], [0], [1], [0, 0, 1, 1], [], []>} : vector<16x64xbf16>, vector<64x32xbf16>, vector<16x32xf32> -> vector<16x32xf32>
    %164 = vector.broadcast %7 : vector<1x32xf32> to vector<16x32xf32>
    %165 = arith.addf %163, %164 : vector<16x32xf32>
    %166 = arith.addf %153, %165 : vector<16x32xf32>
    %cst_61 = arith.constant dense<0.000000e+00> : vector<16xf32>
    %167 = vector.multi_reduction <add>, %166, %cst_61 [1] : vector<16x32xf32> to vector<16xf32>
    %168 = vector.shape_cast %167 : vector<16xf32> to vector<16x1xf32>
    %cst_62 = arith.constant 3.200000e+01 : f32
    %169 = vector.broadcast %cst_62 : f32 to vector<16x1xf32>
    %170 = arith.divf %168, %169 : vector<16x1xf32>
    %171 = vector.broadcast %170 : vector<16x1xf32> to vector<16x32xf32>
    %172 = arith.subf %166, %171 : vector<16x32xf32>
    %173 = arith.mulf %172, %172 : vector<16x32xf32>
    %cst_63 = arith.constant dense<0.000000e+00> : vector<16xf32>
    %174 = vector.multi_reduction <add>, %173, %cst_63 [1] : vector<16x32xf32> to vector<16xf32>
    %175 = vector.shape_cast %174 : vector<16xf32> to vector<16x1xf32>
    %cst_64 = arith.constant 3.200000e+01 : f32
    %176 = vector.broadcast %cst_64 : f32 to vector<16x1xf32>
    %177 = arith.divf %175, %176 : vector<16x1xf32>
    %178 = vector.broadcast %170 : vector<16x1xf32> to vector<16x32xf32>
    %179 = arith.subf %166, %178 : vector<16x32xf32>
    %cst_65 = arith.constant 9.99999974E-6 : f32
    %180 = vector.broadcast %cst_65 : f32 to vector<16x1xf32>
    %181 = arith.addf %177, %180 : vector<16x1xf32>
    %182 = math.rsqrt %181 : vector<16x1xf32>
    %183 = vector.broadcast %182 : vector<16x1xf32> to vector<16x32xf32>
    %184 = arith.mulf %179, %183 : vector<16x32xf32>
    %185 = vector.broadcast %8 : vector<1x32xf32> to vector<16x32xf32>
    %186 = arith.mulf %184, %185 : vector<16x32xf32>
    %187 = vector.broadcast %9 : vector<1x32xf32> to vector<16x32xf32>
    %188 = arith.addf %186, %187 : vector<16x32xf32>
    %c0_66 = arith.constant 0 : index
    %c0_67 = arith.constant 0 : index
    %189 = vector.load %arg6[%c0_66, %c0_67] : memref<16x32xf32, #tpu.memory_space<vmem>>, vector<16x32xf32>
    tpu.vector_store %arg6[%c0_66, %c0_67], %188 {strides = array<i32>} : memref<16x32xf32, #tpu.memory_space<vmem>>, vector<16x32xf32>,
    return
  }
}

</mosaic_0001>

<bundles_post_ra>
// kernel: transformer_encoder_layer.1
= control target key start
LH: loop header
LB: loop body
LE: loop exit
PB: predicated region body
PF: predicated region fallthrough
CT: control target
= control target key end

     0   :  { %11 = vsyncpa [#allocation4], 0  ;;  %s1102_s0 = inlined_call_operand.vmem [shape: f32[16,32], index: 0, kind: input, shape index: {}]   ;;  %s1103_s1 = inlined_call_operand.vmem [shape: bf16[32,96], index: 1, kind: input, shape index: {}]   ;;  %s1104_s2 = inlined_call_operand.vmem [shape: bf16[32,32], index: 2, kind: input, shape index: {}]   ;;  %s1105_s3 = inlined_call_operand.hbm [shape: bf16[32,64], index: 3, kind: input, shape index: {}]   ;;  %s1106_s4 = inlined_call_operand.vmem [shape: bf16[64,32], index: 4, kind: input, shape index: {}]   ;;  %s1107_s5 = inlined_call_operand.hbm [shape: f32[8,96], index: 5, kind: input, shape index: {}]   ;;  %s1108_s6 = inlined_call_operand.hbm [shape: f32[16,32], index: 6, kind: output, shape index: {}]  }
   0x1   :  { %12 = vsyncpa [#allocation7], 0 }
   0x2   :  { %13 = vsyncpa [#allocation5], 0  ;;  %s24_s23 = sshll.u32 %s1105_s3, 4  ;;  %s926_s24 = smov [#allocation3]   ;;  %s25_s23 = int_to_ptr.hbm [resolvable:$true] %s24_s23 }
   0x3   :  { %s26_s25 = sshll.u32 %s926_s24, 4  ;;  %s40_s28 = sshll.u32 %s1107_s5, 4  ;;  %s27_s25 = int_to_ptr.vmem [resolvable:$true] %s26_s25  ;;  %s41_s28 = int_to_ptr.hbm [resolvable:$true] %s40_s28 }
   0x4   :  { %s927_s29 = smov 64   ;;  %s928_s30 = smov 4  }
   0x5   :  { %32 = dma.hbm_to_vmem [thread:$0]  %s25_s23, 256, %s27_s25, [#allocation4], %s927_s29, %s927_s29, %s928_s30  }
   0x6   :  { %s929_s7 = smov [#allocation6]  }
   0x7   :  { %s42_s8 = sshll.u32 %s929_s7, 4  ;;  %s43_s8 = int_to_ptr.vmem [resolvable:$true] %s42_s8 }
   0x8   :  { %45 = dma.hbm_to_vmem [thread:$0]  %s41_s28, 128, %s43_s8, [#allocation7]  }
   0x9   :  { %920 = dma.done.wait [#allocation4], 256  }
   0xa   :  { %921 = vsyncadd [#allocation4], 4294967040 }
   0xb   :  { %922 = dma.done.wait [#allocation7], 128  }
   0xc   :  { %923 = vsyncadd [#allocation7], 4294967168  ;;  %v768_v0 = vld [vmem:[%s1103_s1 + $0x8] sm:$0xff]  ;;  %v767_v1 = vld [vmem:[%s1103_s1] sm:$0xff]  ;;  %vm83_vm0 = vcmask 261120   ;;  %s931_s1 = smov 120   ;;  %v103_v27 = vlaneseq }
   0xd   :  { %v999_v2 = vld [vmem:[%s1102_s0] sm:$0xff]  ;;  %v1004_v3 = vld [vmem:[%s1102_s0 + $0x8] sm:$0xff]  ;;  %93 = vmatpush.bf16.msra.mxu0 %v768_v0  ;;  %s930_s0 = smov 104   ;;  %s932_s15 = smov 96   ;;  %vm155_vm1 = vcmask 64512   ;;  %vm176_vm3 = vcmask 130048  }
   0xe   :  { %v57_v4 = vpack.c.bf16 %v1004_v3, %v999_v2  ;;  %v798_v6 = vld [vmem:[#allocation6] ss:$0 sm:$0xff]  ;;  %s933_s16 = smov 80   ;;  %s934_s17 = smov 72   ;;  %v104_v28 = vshrl.u32 %v103_v27, 7  ;;  %v107_v29 = vand.u32 127, %v103_v27 }
   0xf   :  { %s935_s18 = smov 88   ;;  %s936_s19 = smov 112   ;;  %v937_v33 = vmov -1e+30   ;;  %vm297_vm5 = vcmask 130112   ;;  %vm375_vm6 = vcmask 195712  }
  0x10   :  { %v112_v30 = vand.u32 1, %v104_v28  ;;  %v136_v31 = vand.u32 1, %v107_v29  ;;  %v105_v32 = vadd.s32 8, %v104_v28  ;;  %s938_s20 = smov 56   ;;  %s939_s21 = smov 48   ;;  %vm453_vm7 = vcmask 261312  }
  0x11   :  { %94 = vmatpush.bf16.msra.mxu0 %v767_v1  ;;  %s940_s22 = smov 40   ;;  %s941_s23 = smov 8   ;;  %vm623_vm15 = vcmask 523264  }
  0x12   :  { %vm144_vm2 = vcmp.eq.s32.totalorder %v112_v30, %v136_v31  ;;  %v119_v35 = vand.u32 1, %v105_v32  ;;  %s942_s24 = smov 16   ;;  %s943_s25 = smov 24  }
  0x13   :  { %v146_v34 = vsel %vm144_vm2, 0.0, %v937_v33  ;;  %s701_s14 = sshll.u32 %s1108_s6, 4  ;;  %s702_s14 = int_to_ptr.hbm [resolvable:$true] %s701_s14 }
  0x14   :  { %723 = vmatmul.msk.bf16.vlgmr.msra.gmra.mxu0 %vm83_vm0, %v57_v4  ;;  %vm145_vm4 = vcmp.eq.s32.totalorder %v119_v35, %v136_v31 }
  0x15   :  { %v147_v39 = vsel %vm145_vm4, 0.0, %v937_v33 }
  0x91   :  { %v96_v5 = vpop.f32.mrf.mxu0 }
  0x92   :  { %v97_v7 = vadd.f32 %v798_v6, %v96_v5 }
  0x94   :  { %v101_v9 = vpack.c.bf16 %v97_v7, %v97_v7 }
  0x96   :  { %v150_v12 = vunpack.c.l.b16 %v101_v9 }
  0x99   :  { %v98_v8 = vpop.f32.mrf.mxu0 }
  0x9a   :  { %v99_v10 = vadd.f32 %v798_v6, %v98_v8 }
  0x9c   :  { %v102_v11 = vpack.c.bf16 %v99_v10, %v99_v10 }
  0x9e   :  { %v151_v13 = vunpack.c.l.b16 %v102_v11 }
  0xa0   :  { %v1009_v14 = vpack.c.b16 %v151_v13, %v150_v12 }
  0xa2   :  { %378 = vrot.lane.b32.xlu2 %v1009_v14, %s930_s0  ;;  %222 = vrot.lane.b32.xlu1 %v1009_v14, %s931_s1  ;;  %s946_s0 = smov 128  }
  0xa3   :  { %153 = vrot.lane.b32.xlu0 %v1009_v14, %s932_s15 }
  0xaa   :  { %302 = vrot.lane.b32.xlu2 %v1009_v14, %s933_s16  ;;  %380 = vrot.lane.b32.xlu1 %v1009_v14, %s934_s17 }
  0xab   :  { %224 = vrot.lane.b32.xlu0 %v1009_v14, %s935_s18 }
  0xb3   :  { %300 = vrot.lane.b32.xlu0 %v1009_v14, %s936_s19 }
  0xbb   :  { %190 = vrot.lane.b32.xlu0 %v1009_v14, %s927_s29 }
  0xfc   :  { %v379_v15 = vpop.permute.xlu2 %378 }
 0x104   :  { %v303_v16 = vpop.permute.xlu2 %302 }
 0x105   :  { %v308_v17 = vsel %vm155_vm1, %v303_v16, 0 }
 0x106   :  { %317 = vmatpush.bf16.xpose.msrb.mxu0 %v308_v17 }
 0x114   :  { %v223_v18 = vpop.permute.xlu1 %222 }
 0x115   :  { %v154_v19 = vpop.permute.xlu0 %153 }
 0x116   :  { %v160_v20 = vsel %vm155_vm1, %v154_v19, 0 }
 0x117   :  { %169 = vmatpush.bf16.xpose.msra.mxu1 %v160_v20 }
 0x11c   :  { %v381_v21 = vpop.permute.xlu1 %380 }
 0x11d   :  { %v225_v22 = vpop.permute.xlu0 %224  ;;  %v386_v23 = vsel %vm155_vm1, %v381_v21, 0 }
 0x11e   :  { %724 = vmatmul.msk.bf16.vlgmr.msra.gmra.mxu1 %vm155_vm1, %v1009_v14  ;;  %v230_v24 = vsel %vm155_vm1, %v225_v22, 0 }
 0x11f   :  { %239 = vmatpush.bf16.xpose.msra.mxu3 %v230_v24 }
 0x125   :  { %v301_v25 = vpop.permute.xlu0 %300 }
 0x126   :  { %726 = vmatmul.msk.bf16.vlgmr.msra.gmra.mxu3 %vm155_vm1, %v223_v18  ;;  %728 = vmatmul.msk.bf16.vlgmr.msrb.gmra.mxu0 %vm155_vm1, %v301_v25 }
 0x127   :  { %395 = vmatpush.bf16.xpose.msrb.mxu3 %v386_v23 }
 0x12d   :  { %v191_v26 = vpop.permute.xlu0 %190 }
 0x12e   :  { %203 = vmatpush.bf16.msra.mxu2 %v191_v26 }
 0x136   :  { %730 = vmatmul.msk.bf16.vlgmr.msrb.gmra.mxu3 %vm155_vm1, %v379_v15 }
 0x19b   :  { %v171_v36 = vpop.f32.mrf.mxu1 }
 0x19c   :  { %v172_v37 = vadd.f32 %v171_v36, %v146_v34 }
 0x19e   :  { %v177_v38 = vsel %vm176_vm3, %v172_v37, -inf }
 0x19f   :  { %178 = vmax.xlane.f32.xlu1 %v177_v38 }
 0x1a3   :  { %v173_v40 = vpop.f32.mrf.mxu1  ;;  %v319_v46 = vpop.f32.mrf.mxu0 }
 0x1a4   :  { %v174_v41 = vadd.f32 %v173_v40, %v147_v39  ;;  %v320_v47 = vadd.f32 %v319_v46, %v146_v34 }
 0x1a6   :  { %v180_v42 = vsel %vm176_vm3, %v174_v41, -inf  ;;  %v324_v51 = vsel %vm176_vm3, %v320_v47, -inf }
 0x1a7   :  { %181 = vmax.xlane.f32.xlu2 %v180_v42 }
 0x1a9   :  { %v241_v43 = vpop.f32.mrf.mxu3 }
 0x1aa   :  { %v242_v44 = vadd.f32 %v241_v43, %v146_v34 }
 0x1ab   :  { %v321_v58 = vpop.f32.mrf.mxu0 }
 0x1ac   :  { %v246_v45 = vsel %vm176_vm3, %v242_v44, -inf  ;;  %v322_v59 = vadd.f32 %v321_v58, %v147_v39 }
 0x1ad   :  { %247 = vmax.xlane.f32.xlu0 %v246_v45 }
 0x1ae   :  { %v327_v60 = vsel %vm176_vm3, %v322_v59, -inf }
 0x1b1   :  { %v243_v48 = vpop.f32.mrf.mxu3 }
 0x1b2   :  { %v244_v49 = vadd.f32 %v243_v48, %v147_v39 }
 0x1b4   :  { %v249_v50 = vsel %vm176_vm3, %v244_v49, -inf }
 0x1b5   :  { %250 = vmax.xlane.f32.xlu2 %v249_v50  ;;  %325 = vmax.xlane.f32.xlu0 %v324_v51 }
 0x1b8   :  { %259 = vrot.lane.b32.xlu1 %v1009_v14, %s938_s20 }
 0x1b9   :  { %v397_v52 = vpop.f32.mrf.mxu3 }
 0x1ba   :  { %v398_v53 = vadd.f32 %v397_v52, %v146_v34 }
 0x1bc   :  { %v402_v54 = vsel %vm176_vm3, %v398_v53, -inf }
 0x1bd   :  { %403 = vmax.xlane.f32.xlu2 %v402_v54 }
 0x1c0   :  { %337 = vrot.lane.b32.xlu1 %v1009_v14, %s939_s21 }
 0x1c1   :  { %v399_v55 = vpop.f32.mrf.mxu3 }
 0x1c2   :  { %v400_v56 = vadd.f32 %v399_v55, %v147_v39 }
 0x1c4   :  { %v405_v57 = vsel %vm176_vm3, %v400_v56, -inf }
 0x1c5   :  { %406 = vmax.xlane.f32.xlu2 %v405_v57 }
 0x1c9   :  { %415 = vrot.lane.b32.xlu0 %v1009_v14, %s940_s22 }
 0x1cd   :  { %328 = vmax.xlane.f32.xlu2 %v327_v60 }
 0x212   :  { %v179_v61 = vpop.xlane.xlu1 %178 }
 0x213   :  { %v183_v62 = vsub.f32 %v172_v37, %v179_v61 }
 0x215   :  { %v185_v63 = vmul.f32 1.442695, %v183_v62 }
 0x217   :  { %806 = vpow2.f32 %v185_v63 }
 0x21a   :  { %v182_v0 = vpop.xlane.xlu2 %181 }
 0x21b   :  { %v184_v1 = vsub.f32 %v174_v41, %v182_v0 }
 0x21d   :  { %v187_v4 = vmul.f32 1.442695, %v184_v1  ;;  %v807_v6 = vpop.eup %806 }
 0x21e   :  { %v210_v32 = vsel %vm176_vm3, %v807_v6, 0.0 }
 0x21f   :  { %808 = vpow2.f32 %v187_v4 }
 0x220   :  { %v248_v5 = vpop.xlane.xlu0 %247 }
 0x221   :  { %v252_v9 = vsub.f32 %v242_v44, %v248_v5 }
 0x223   :  { %v254_v15 = vmul.f32 1.442695, %v252_v9 }
 0x225   :  { %v809_v7 = vpop.eup %808 }
 0x226   :  { %v189_v8 = vpack.c.bf16 %v809_v7, %v807_v6  ;;  %v213_v43 = vsel %vm176_vm3, %v809_v7, 0.0 }
 0x228   :  { %v251_v10 = vpop.xlane.xlu2 %250  ;;  %725 = vmatmul.msk.bf16.vlgmr.msra.gmra.mxu2 %vm176_vm3, %v189_v8  ;;  %v326_v11 = vpop.xlane.xlu0 %325 }
 0x229   :  { %v253_v12 = vsub.f32 %v244_v49, %v251_v10  ;;  %v330_v13 = vsub.f32 %v320_v47, %v326_v11 }
 0x22a   :  { %v260_v14 = vpop.permute.xlu1 %259 }
 0x22b   :  { %v256_v16 = vmul.f32 1.442695, %v253_v12  ;;  %v332_v17 = vmul.f32 1.442695, %v330_v13  ;;  %272 = vmatpush.bf16.msrb.mxu2 %v260_v14 }
 0x22d   :  { %810 = vpow2.f32 %v256_v16 }
 0x22e   :  { %812 = vpow2.f32 %v332_v17  ;;  %v770_v17 = vld [vmem:[%s1104_s2 + $0x8] sm:$0xff] }
 0x22f   :  { %814 = vpow2.f32 %v254_v15  ;;  %485 = vmatpush.bf16.msra.mxu0 %v770_v17 }
 0x230   :  { %v404_v18 = vpop.xlane.xlu2 %403 }
 0x231   :  { %v408_v26 = vsub.f32 %v398_v53, %v404_v18  ;;  %v769_v18 = vld [vmem:[%s1104_s2] sm:$0xff] }
 0x232   :  { %v338_v19 = vpop.permute.xlu1 %337 }
 0x233   :  { %v811_v20 = vpop.eup %810  ;;  %350 = vmatpush.bf16.msrb.mxu1 %v338_v19  ;;  %v410_v29 = vmul.f32 1.442695, %v408_v26  ;;  %486 = vmatpush.bf16.msra.mxu0 %v769_v18 }
 0x234   :  { %v813_v21 = vpop.eup %812  ;;  %v282_v22 = vsel %vm176_vm3, %v811_v20, 0.0 }
 0x235   :  { %v815_v23 = vpop.eup %814  ;;  %283 = vadd.xlane.f32.xlu1 %v282_v22  ;;  %v357_v24 = vsel %vm176_vm3, %v813_v21, 0.0 }
 0x236   :  { %358 = vadd.xlane.f32.xlu2 %v357_v24  ;;  %v258_v25 = vpack.c.bf16 %v811_v20, %v815_v23  ;;  %v279_v38 = vsel %vm176_vm3, %v815_v23, 0.0 }
 0x238   :  { %v407_v27 = vpop.xlane.xlu2 %406  ;;  %727 = vmatmul.msk.bf16.vlgmr.msrb.gmra.mxu2 %vm176_vm3, %v258_v25 }
 0x239   :  { %v409_v28 = vsub.f32 %v400_v56, %v407_v27  ;;  %v799_v27 = vld [vmem:[#allocation6 + $0x1] ss:$0 sm:$0xff] }
 0x23b   :  { %v412_v30 = vmul.f32 1.442695, %v409_v28  ;;  %v416_v31 = vpop.permute.xlu0 %415 }
 0x23c   :  { %428 = vmatpush.bf16.msra.mxu2 %v416_v31 }
 0x23d   :  { %816 = vpow2.f32 %v412_v30 }
 0x23e   :  { %211 = vadd.xlane.f32.xlu2 %v210_v32  ;;  %818 = vpow2.f32 %v410_v29 }
 0x240   :  { %v329_v33 = vpop.xlane.xlu2 %328 }
 0x241   :  { %v331_v34 = vsub.f32 %v322_v59, %v329_v33 }
 0x243   :  { %v817_v35 = vpop.eup %816  ;;  %v334_v36 = vmul.f32 1.442695, %v331_v34 }
 0x244   :  { %v819_v37 = vpop.eup %818  ;;  %v438_v45 = vsel %vm176_vm3, %v817_v35, 0.0 }
 0x245   :  { %820 = vpow2.f32 %v334_v36  ;;  %v414_v39 = vpack.c.bf16 %v817_v35, %v819_v37  ;;  %v435_v44 = vsel %vm176_vm3, %v819_v37, 0.0  ;;  %v944_v36 = vmov 32.0  }
 0x246   :  { %280 = vadd.xlane.f32.xlu2 %v279_v38 }
 0x248   :  { %731 = vmatmul.msk.bf16.vlgmr.msra.gmra.mxu2 %vm176_vm3, %v414_v39 }
 0x24b   :  { %v821_v40 = vpop.eup %820 }
 0x24c   :  { %v360_v41 = vsel %vm176_vm3, %v821_v40, 0.0  ;;  %v336_v42 = vpack.c.bf16 %v821_v40, %v813_v21 }
 0x24d   :  { %361 = vadd.xlane.f32.xlu0 %v360_v41 }
 0x24e   :  { %214 = vadd.xlane.f32.xlu2 %v213_v43  ;;  %729 = vmatmul.msk.bf16.vlgmr.msrb.gmra.mxu1 %vm176_vm3, %v336_v42 }
 0x256   :  { %436 = vadd.xlane.f32.xlu2 %v435_v44 }
 0x25e   :  { %439 = vadd.xlane.f32.xlu2 %v438_v45 }
 0x2a8   :  { %v284_v53 = vpop.xlane.xlu1 %283 }
 0x2a9   :  { %v359_v46 = vpop.xlane.xlu2 %358 }
 0x2ab   :  { %v205_v47 = vpop.f32.mrf.mxu2 }
 0x2b1   :  { %v212_v48 = vpop.xlane.xlu2 %211 }
 0x2b2   :  { %822 = vrcp.f32 %v212_v48 }
 0x2b3   :  { %v207_v49 = vpop.f32.mrf.mxu2 }
 0x2b8   :  { %v823_v50 = vpop.eup %822 }
 0x2b9   :  { %v218_v51 = vmul.f32 %v823_v50, %v205_v47  ;;  %v281_v52 = vpop.xlane.xlu2 %280 }
 0x2ba   :  { %824 = vrcp.f32 %v281_v52 }
 0x2bb   :  { %220 = vst.msk [vmem:[#allocation2] sm:$0xff] %vm155_vm1, %v218_v51  ;;  %v274_v54 = vpop.f32.mrf.mxu2  ;;  %826 = vrcp.f32 %v284_v53  ;;  %v772_v51 = vld [vmem:[#allocation3 + $0x8] sm:$0xff] }
 0x2bc   :  { %579 = vmatpush.bf16.msra.mxu1 %v772_v51 }
 0x2c0   :  { %v825_v55 = vpop.eup %824  ;;  %v362_v0 = vpop.xlane.xlu0 %361 }
 0x2c1   :  { %v287_v56 = vmul.f32 %v825_v55, %v274_v54  ;;  %v215_v57 = vpop.xlane.xlu2 %214  ;;  %v827_v58 = vpop.eup %826  ;;  %v771_v54 = vld [vmem:[#allocation3] sm:$0xff] }
 0x2c2   :  { %828 = vrcp.f32 %v215_v57  ;;  %580 = vmatpush.bf16.msra.mxu1 %v771_v54 }
 0x2c3   :  { %291 = vrot.lane.b32.xlu1 %v287_v56, %s941_s23  ;;  %v276_v59 = vpop.f32.mrf.mxu2  ;;  %830 = vrcp.f32 %v359_v46  ;;  %v776_v56 = vld [vmem:[%s1106_s4 + $0x18] sm:$0xff] }
 0x2c4   :  { %v288_v60 = vmul.f32 %v827_v58, %v276_v59  ;;  %631 = vmatpush.bf16.msra.mxu3 %v776_v56 }
 0x2c6   :  { %293 = vrot.lane.b32.xlu2 %v288_v60, %s941_s23 }
 0x2c8   :  { %v829_v61 = vpop.eup %828 }
 0x2c9   :  { %v219_v62 = vmul.f32 %v829_v61, %v207_v49  ;;  %v437_v63 = vpop.xlane.xlu2 %436  ;;  %v831_v1 = vpop.eup %830 }
 0x2ca   :  { %832 = vrcp.f32 %v437_v63 }
 0x2cb   :  { %221 = vst.msk [vmem:[#allocation2 + $0x8] sm:$0xff] %vm155_vm1, %v219_v62  ;;  %v352_v4 = vpop.f32.mrf.mxu1  ;;  %834 = vrcp.f32 %v362_v0  ;;  %v430_v6 = vpop.f32.mrf.mxu2 }
 0x2cc   :  { %v365_v5 = vmul.f32 %v831_v1, %v352_v4 }
 0x2ce   :  { %369 = vrot.lane.b32.xlu0 %v365_v5, %s942_s24 }
 0x2d0   :  { %v833_v7 = vpop.eup %832 }
 0x2d1   :  { %v443_v8 = vmul.f32 %v833_v7, %v430_v6  ;;  %v440_v9 = vpop.xlane.xlu2 %439  ;;  %v835_v10 = vpop.eup %834 }
 0x2d2   :  { %836 = vrcp.f32 %v440_v9 }
 0x2d3   :  { %447 = vrot.lane.b32.xlu2 %v443_v8, %s943_s25  ;;  %v354_v11 = vpop.f32.mrf.mxu1  ;;  %v432_v14 = vpop.f32.mrf.mxu2  ;;  %838 = vrcp.f32 %v944_v36 }
 0x2d4   :  { %v366_v12 = vmul.f32 %v835_v10, %v354_v11  ;;  %v800_v10 = vld [vmem:[#allocation6 + $0x2] ss:$0 sm:$0xff] }
 0x2d6   :  { %371 = vrot.lane.b32.xlu1 %v366_v12, %s942_s24 }
 0x2d8   :  { %v837_v13 = vpop.eup %836 }
 0x2d9   :  { %v444_v15 = vmul.f32 %v837_v13, %v432_v14  ;;  %v839_v37 = vpop.eup %838  ;;  %v801_v14 = vld [vmem:[#allocation6 + $0x3] ss:$0 sm:$0xff] }
 0x2da   :  { %v502_v38 = vmul.f32 32.0, %v839_v37  ;;  %vm506_vm8 = vweird.f32 %v839_v37 }
 0x2db   :  { %449 = vrot.lane.b32.xlu0 %v444_v15, %s943_s25 }
 0x2dc   :  { %v503_v39 = vsub.f32 1.0, %v502_v38 }
 0x2de   :  { %v504_v40 = vmul.f32 %v839_v37, %v503_v39 }
 0x2e0   :  { %v505_v41 = vadd.f32 %v839_v37, %v504_v40 }
 0x2e2   :  { %v1067_v42 = vsel %vm506_vm8, %v839_v37, %v505_v41 }
 0x320   :  { %v294_v16 = vpop.permute.xlu2 %293 }
 0x321   :  { %299 = vst.msk [vmem:[#allocation2 + $0x8] sm:$0xff] %vm297_vm5, %v294_v16 }
 0x32d   :  { %v448_v21 = vpop.permute.xlu2 %447 }
 0x335   :  { %v292_v19 = vpop.permute.xlu1 %291 }
 0x336   :  { %298 = vst.msk [vmem:[#allocation2] sm:$0xff] %vm297_vm5, %v292_v19 }
 0x340   :  { %v370_v20 = vpop.permute.xlu0 %369 }
 0x341   :  { %376 = vst.msk [vmem:[#allocation2] sm:$0xff] %vm375_vm6, %v370_v20 }
 0x342   :  { %454 = vst.msk [vmem:[#allocation2] sm:$0xff] %vm453_vm7, %v448_v21  ;;  %v775_v21 = vld [vmem:[%s1106_s4 + $0x10] sm:$0xff] }
 0x343   :  { %632 = vmatpush.bf16.msra.mxu3 %v775_v21 }
 0x348   :  { %v372_v22 = vpop.permute.xlu1 %371 }
 0x349   :  { %377 = vst.msk [vmem:[#allocation2 + $0x8] sm:$0xff] %vm375_vm6, %v372_v22  ;;  %v456_v24 = vld [vmem:[#allocation2] sm:$0xff]  ;;  %v774_v22 = vld [vmem:[%s1106_s4 + $0x8] sm:$0xff] }
 0x34a   :  { %633 = vmatpush.bf16.msra.mxu3 %v774_v22 }
 0x34d   :  { %v450_v23 = vpop.permute.xlu0 %449 }
 0x34e   :  { %455 = vst.msk [vmem:[#allocation2 + $0x8] sm:$0xff] %vm453_vm7, %v450_v23  ;;  %v773_v23 = vld [vmem:[%s1106_s4] sm:$0xff]  ;;  %s945_s4 = smov [#allocation8]  }
 0x34f   :  { %634 = vmatpush.bf16.msra.mxu3 %v773_v23  ;;  %s699_s11 = sshll.u32 %s945_s4, 4  ;;  %s700_s11 = int_to_ptr.vmem [resolvable:$true] %s699_s11 }
 0x355   :  { %v457_v25 = vld [vmem:[#allocation2 + $0x8] sm:$0xff] }
 0x356   :  { %v458_v26 = vpack.c.bf16 %v457_v25, %v456_v24  ;;  %v802_v25 = vld [vmem:[#allocation6 + $0x4] ss:$0 sm:$0xff] }
 0x358   :  { %740 = vmatmul.msk.bf16.vlgmr.msra.gmra.mxu0 %vm83_vm0, %v458_v26 }
 0x3d5   :  { %v488_v28 = vpop.f32.mrf.mxu0 }
 0x3d6   :  { %v489_v29 = vadd.f32 %v799_v27, %v488_v28 }
 0x3d8   :  { %v493_v30 = vadd.f32 %v489_v29, %v999_v2 }
 0x3da   :  { %v495_v31 = vsel %vm83_vm0, %v493_v30, 0.0 }
 0x3db   :  { %496 = vadd.xlane.f32.xlu1 %v495_v31 }
 0x3dd   :  { %v490_v32 = vpop.f32.mrf.mxu0 }
 0x3de   :  { %v491_v33 = vadd.f32 %v799_v27, %v490_v32  ;;  %v803_v32 = vld [vmem:[#allocation6 + $0x5] ss:$0 sm:$0xff] }
 0x3e0   :  { %v494_v34 = vadd.f32 %v491_v33, %v1004_v3 }
 0x3e2   :  { %v498_v35 = vsel %vm83_vm0, %v494_v34, 0.0 }
 0x3e3   :  { %499 = vadd.xlane.f32.xlu2 %v498_v35 }
 0x44e   :  { %v497_v2 = vpop.xlane.xlu1 %496 }
 0x44f   :  { %v508_v43 = vmul.f32 %v1067_v42, %v497_v2 }
 0x451   :  { %v510_v44 = vsub.f32 %v493_v30, %v508_v43 }
 0x453   :  { %v512_v45 = vmul.f32 %v510_v44, %v510_v44 }
 0x455   :  { %v514_v3 = vsel %vm83_vm0, %v512_v45, 0.0 }
 0x456   :  { %v500_v46 = vpop.xlane.xlu2 %499  ;;  %515 = vadd.xlane.f32.xlu0 %v514_v3 }
 0x457   :  { %v509_v47 = vmul.f32 %v1067_v42, %v500_v46 }
 0x459   :  { %v511_v48 = vsub.f32 %v494_v34, %v509_v47 }
 0x45b   :  { %v513_v49 = vmul.f32 %v511_v48, %v511_v48 }
 0x45d   :  { %v517_v50 = vsel %vm83_vm0, %v513_v49, 0.0 }
 0x45e   :  { %518 = vadd.xlane.f32.xlu1 %v517_v50 }
 0x4c9   :  { %v516_v52 = vpop.xlane.xlu0 %515 }
 0x4ca   :  { %v520_v53 = vmul.f32 %v516_v52, %v1067_v42 }
 0x4cc   :  { %v522_v55 = vadd.f32 1e-05, %v520_v53 }
 0x4ce   :  { %840 = vrsqrt.f32 %v522_v55  ;;  %vm530_vm10 = vweird.f32 %v522_v55 }
 0x4d1   :  { %v519_v57 = vpop.xlane.xlu1 %518 }
 0x4d2   :  { %v521_v58 = vmul.f32 %v519_v57, %v1067_v42 }
 0x4d4   :  { %v841_v59 = vpop.eup %840  ;;  %v523_v60 = vadd.f32 1e-05, %v521_v58 }
 0x4d5   :  { %v525_v61 = vmul.f32 %v841_v59, %v522_v55  ;;  %vm531_vm9 = vweird.f32 %v841_v59 }
 0x4d6   :  { %842 = vrsqrt.f32 %v523_v60  ;;  %vm532_vm11 = vmor %vm530_vm10, %vm531_vm9  ;;  %vm540_vm13 = vweird.f32 %v523_v60 }
 0x4d7   :  { %v526_v62 = vmul.f32 %v841_v59, %v525_v61 }
 0x4d9   :  { %v527_v63 = vmul.f32 0.5, %v526_v62 }
 0x4db   :  { %v528_v0 = vsub.f32 1.5, %v527_v63 }
 0x4dc   :  { %v843_v1 = vpop.eup %842 }
 0x4dd   :  { %v529_v4 = vmul.f32 %v841_v59, %v528_v0  ;;  %v535_v5 = vmul.f32 %v843_v1, %v523_v60  ;;  %vm541_vm12 = vweird.f32 %v843_v1  ;;  %v804_v0 = vld [vmem:[#allocation6 + $0x6] ss:$0 sm:$0xff] }
 0x4de   :  { %vm542_vm14 = vmor %vm540_vm13, %vm541_vm12 }
 0x4df   :  { %v536_v6 = vmul.f32 %v843_v1, %v535_v5  ;;  %v533_v7 = vsel %vm532_vm11, %v841_v59, %v529_v4  ;;  %v805_v5 = vld [vmem:[#allocation6 + $0x7] ss:$0 sm:$0xff] }
 0x4e0   :  { %v544_v11 = vmul.f32 %v533_v7, %v510_v44 }
 0x4e1   :  { %v537_v8 = vmul.f32 0.5, %v536_v6 }
 0x4e2   :  { %v547_v15 = vmul.f32 %v800_v10, %v544_v11 }
 0x4e3   :  { %v538_v9 = vsub.f32 1.5, %v537_v8 }
 0x4e4   :  { %v550_v18 = vadd.f32 %v801_v14, %v547_v15 }
 0x4e5   :  { %v539_v12 = vmul.f32 %v843_v1, %v538_v9 }
 0x4e7   :  { %v543_v13 = vsel %vm542_vm14, %v843_v1, %v539_v12 }
 0x4e8   :  { %v545_v16 = vmul.f32 %v543_v13, %v511_v48 }
 0x4ea   :  { %v548_v17 = vmul.f32 %v800_v10, %v545_v16 }
 0x4ec   :  { %v551_v19 = vadd.f32 %v801_v14, %v548_v17 }
 0x4ee   :  { %v552_v20 = vpack.c.bf16 %v551_v19, %v550_v18 }
 0x4f0   :  { %749 = vmatmul.msk.bf16.vlgmr.msra.gmra.mxu1 %vm83_vm0, %v552_v20 }
 0x56d   :  { %v582_v24 = vpop.f32.mrf.mxu1 }
 0x56e   :  { %v583_v26 = vadd.f32 %v802_v25, %v582_v24 }
 0x570   :  { %v587_v29 = vmax.f32 %v583_v26, 0.0 }
 0x575   :  { %v584_v27 = vpop.f32.mrf.mxu1 }
 0x576   :  { %v585_v28 = vadd.f32 %v802_v25, %v584_v27 }
 0x578   :  { %v588_v30 = vmax.f32 %v585_v28, 0.0 }
 0x57a   :  { %v589_v31 = vpack.c.bf16 %v588_v30, %v587_v29 }
 0x57c   :  { %766 = vmatmul.msk.bf16.vlgmr.msra.gmra.mxu3 %vm623_vm15, %v589_v31 }
 0x5ff   :  { %v636_v33 = vpop.f32.mrf.mxu3 }
 0x600   :  { %v637_v34 = vadd.f32 %v803_v32, %v636_v33 }
 0x602   :  { %v641_v35 = vadd.f32 %v637_v34, %v550_v18 }
 0x604   :  { %v643_v36 = vsel %vm83_vm0, %v641_v35, 0.0 }
 0x605   :  { %644 = vadd.xlane.f32.xlu2 %v643_v36 }
 0x607   :  { %v638_v37 = vpop.f32.mrf.mxu3 }
 0x608   :  { %v639_v38 = vadd.f32 %v803_v32, %v638_v37 }
 0x60a   :  { %v642_v39 = vadd.f32 %v639_v38, %v551_v19 }
 0x60c   :  { %v646_v40 = vsel %vm83_vm0, %v642_v39, 0.0 }
 0x60d   :  { %647 = vadd.xlane.f32.xlu0 %v646_v40 }
 0x678   :  { %v645_v41 = vpop.xlane.xlu2 %644 }
 0x679   :  { %v649_v2 = vmul.f32 %v645_v41, %v1067_v42 }
 0x67b   :  { %v651_v43 = vsub.f32 %v641_v35, %v649_v2 }
 0x67d   :  { %v653_v44 = vmul.f32 %v651_v43, %v651_v43 }
 0x67f   :  { %v655_v45 = vsel %vm83_vm0, %v653_v44, 0.0 }
 0x680   :  { %v648_v3 = vpop.xlane.xlu0 %647  ;;  %656 = vadd.xlane.f32.xlu1 %v655_v45 }
 0x681   :  { %v650_v46 = vmul.f32 %v648_v3, %v1067_v42 }
 0x683   :  { %v652_v47 = vsub.f32 %v642_v39, %v650_v46 }
 0x685   :  { %v654_v48 = vmul.f32 %v652_v47, %v652_v47 }
 0x687   :  { %v658_v49 = vsel %vm83_vm0, %v654_v48, 0.0 }
 0x688   :  { %659 = vadd.xlane.f32.xlu2 %v658_v49 }
 0x6f3   :  { %v657_v50 = vpop.xlane.xlu1 %656 }
 0x6f4   :  { %v661_v51 = vmul.f32 %v657_v50, %v1067_v42 }
 0x6f6   :  { %v663_v52 = vadd.f32 1e-05, %v661_v51 }
 0x6f8   :  { %844 = vrsqrt.f32 %v663_v52  ;;  %vm671_vm2 = vweird.f32 %v663_v52 }
 0x6fb   :  { %v660_v53 = vpop.xlane.xlu2 %659 }
 0x6fc   :  { %v662_v54 = vmul.f32 %v660_v53, %v1067_v42 }
 0x6fe   :  { %v845_v55 = vpop.eup %844  ;;  %v664_v56 = vadd.f32 1e-05, %v662_v54 }
 0x6ff   :  { %v666_v57 = vmul.f32 %v845_v55, %v663_v52  ;;  %vm672_vm1 = vweird.f32 %v845_v55 }
 0x700   :  { %846 = vrsqrt.f32 %v664_v56  ;;  %vm673_vm3 = vmor %vm671_vm2, %vm672_vm1  ;;  %vm681_vm5 = vweird.f32 %v664_v56 }
 0x701   :  { %v667_v58 = vmul.f32 %v845_v55, %v666_v57 }
 0x703   :  { %v668_v59 = vmul.f32 0.5, %v667_v58 }
 0x705   :  { %v669_v60 = vsub.f32 1.5, %v668_v59 }
 0x706   :  { %v847_v61 = vpop.eup %846 }
 0x707   :  { %v670_v62 = vmul.f32 %v845_v55, %v669_v60  ;;  %v676_v63 = vmul.f32 %v847_v61, %v664_v56  ;;  %vm682_vm4 = vweird.f32 %v847_v61 }
 0x708   :  { %vm683_vm6 = vmor %vm681_vm5, %vm682_vm4 }
 0x709   :  { %v674_v1 = vsel %vm673_vm3, %v845_v55, %v670_v62  ;;  %v677_v4 = vmul.f32 %v847_v61, %v676_v63 }
 0x70a   :  { %v685_v6 = vmul.f32 %v674_v1, %v651_v43 }
 0x70b   :  { %v678_v7 = vmul.f32 0.5, %v677_v4 }
 0x70c   :  { %v688_v42 = vmul.f32 %v804_v0, %v685_v6 }
 0x70d   :  { %v679_v8 = vsub.f32 1.5, %v678_v7 }
 0x70e   :  { %v691_v9 = vadd.f32 %v805_v5, %v688_v42 }
 0x70f   :  { %v680_v10 = vmul.f32 %v847_v61, %v679_v8 }
 0x710   :  { %693 = vst.msk [vmem:[#allocation8] sm:$0xff] %vm83_vm0, %v691_v9 }
 0x711   :  { %v684_v11 = vsel %vm683_vm6, %v847_v61, %v680_v10 }
 0x712   :  { %v686_v12 = vmul.f32 %v684_v11, %v652_v47 }
 0x714   :  { %v689_v13 = vmul.f32 %v804_v0, %v686_v12 }
 0x716   :  { %v692_v14 = vadd.f32 %v805_v5, %v689_v13 }
 0x718   :  { %694 = vst.msk [vmem:[#allocation8 + $0x8] sm:$0xff] %vm83_vm0, %v692_v14 }
 0x719   :  { %707 = dma.vmem_to_hbm [thread:$0]  %s700_s11, 256, %s702_s14, [#allocation5], %s946_s0, %s946_s0, %s941_s23  }
 0x71a   :  { %924 = dma.done.wait [#allocation5], 256  }
 0x71b   :  { %925 = vsyncadd [#allocation5], 4294967040 }
 0x71c   :  { %712 = vsyncpa [#allocation4], 1 }
 0x71d   :  { %713 = vsyncpa [#allocation7], 1 }
 0x71e   :  { %714 = vsyncpa [#allocation5], 1 }

</bundles_post_ra>
